<compile_context>
chip_gen: v7x
topology: tpu7x:2x2x1
jax: 0.10.0
libtpu: 0.0.40
codegen_flags: <defaults>
</compile_context>

<pallas_src>
import numpy as np
import jax
import jax.numpy as jnp
from jax.experimental import pallas as pl
from jax.experimental.pallas import tpu as pltpu

LAMBDA_INV = 0.5          # utils.args.lambda_inv
THETA_MAX = 2.0           # utils.args.theta_max


def _local_modulation(nl):
    """Piecewise modulation, algebraically identical to PyTorch local_modulation."""
    li, tm = LAMBDA_INV, THETA_MAX
    inv_li2 = 1.0 / (li * li)
    p1 = tm - (tm - 1.0) * (4.0 * nl - li) ** 2 * inv_li2
    p2 = 4.0 * (nl - li) ** 2 * inv_li2
    p3 = -p2                                   # -(2li - nl - li)^2/li^2*4 == -p2
    p4 = (tm - 1.0) * (4.0 * (2.0 * li - nl) - li) ** 2 * inv_li2 - tm
    return jnp.where(nl <= 0.5 * li, p1,
           jnp.where(nl <= li, p2,
           jnp.where(nl <= 1.5 * li, p3, p4)))


def _fc_block_kernel(x_ref, w_ref, b_ref, cls_ref, tbl_ref, y_ref, mod_ref):
    # ---- fc: x @ W^T  (weight pre-transposed to [IN, TN] in the wrapper ->
    # plain MN matmul on the MXU, no per-tile relayout; bf16 in, f32 acc) ----
    z = jnp.dot(x_ref[...], w_ref[...], preferred_element_type=jnp.float32)
    y_ref[...] = jnp.tanh(z + b_ref[...]).astype(y_ref.dtype)
    # activation='tanh'; dropout=0.0 -> identity (no-op).

    # ---- modulation: gather precomputed per-class rows by class id.  The
    # piecewise polynomial is hoisted to the wrapper; only NC-1 compares +
    # selects remain here (pure VPU work, no MXU push, no zeros materialized).
    cls = cls_ref[...]                             # [TB, 1] int32
    nc = tbl_ref.shape[0]
    mod = tbl_ref[0:1, :]                          # seed with class-0 row
    for c in range(1, nc):                         # tiny static unroll; switch to a
        mod = jnp.where(cls == c,                  # one-hot MXU matmul if nc > ~16
                        tbl_ref[c:c + 1, :], mod)
    mod_ref[...] = jnp.broadcast_to(mod, mod_ref.shape).astype(mod_ref.dtype)
    # TODO(synk): PyTorch calls x.backward(gradient=local_modulation(...)); that
    # gradient-injection side effect has no forward-pass Pallas equivalent, so
    # the modulation tensor is returned instead.


def _expectation_indices(num_classes):
    """Static (per-config) scatter indices used by the PyTorch expectation()."""
    if num_classes == 1:
        # PyTorch code hits 0/0 here; define the degenerate case sensibly.
        return np.zeros((1,), np.int32), np.ones((1,), np.int32)
    sigma, delta_mu = 1, 1
    max_len = num_classes
    a = np.array([np.sqrt(2) * np.sqrt(np.log(max_len / i)) * sigma
                  for i in range(1, max_len + 1)])
    a = a / a.max() * (2 * (max_len - delta_mu))
    b = delta_mu + a
    return a.astype('int32'), b.astype('int32')   # same truncation as .astype('int')


def _round_up(x, m):
    return ((x + m - 1) // m) * m


def _vmem_capacity_bytes():
    try:
        return int(pltpu.get_tpu_info().vmem_capacity_bytes)
    except Exception:
        return 64 << 20   # conservative fallback: v7x per-TensorCore VMEM


def fc_block_forward(x, w, b, labels, ni, *,
                     matmul_dtype=jnp.bfloat16, out_dtype=jnp.float32):
    """Returns (y, modulation):
       y   = tanh(x @ w.T + b)                    (dropout = 0 -> identity)
       mod = local_modulation(expectation(labels) @ NI.view(-1, OUT))
    Note: PyTorch expectation() itself uses torch.max(labels,1)[1] (argmax), so
    the class-index path below matches it for soft labels as well."""
    B, IN = x.shape
    OUT = w.shape[0]
    NC = labels.shape[1]

    # ---- wrapper-side glue (grid-invariant; computed once in plain JAX) ----
    a_idx, b_idx = _expectation_indices(NC)
    cls = jnp.argmax(labels, axis=1).astype(jnp.int32).reshape(B, 1)
    ni_flat = jnp.asarray(ni, jnp.float32).reshape(2 * NC, OUT)
    nl_tbl = 0.5 * (ni_flat[a_idx, :] + ni_flat[b_idx, :])      # [NC, OUT] == E_row @ NI
    mod_tbl = _local_modulation(nl_tbl)                         # hoisted piecewise poly
    wt = jnp.asarray(w, jnp.float32).T.astype(matmul_dtype)     # one-time [IN, OUT]
    x_mm = jnp.asarray(x, jnp.float32).astype(matmul_dtype)
    b2 = jnp.asarray(b, jnp.float32).reshape(1, OUT)

    # ---- generation-aware tile / VMEM-budget selection ----
    vmem_cap = _vmem_capacity_bytes()
    big_vmem = vmem_cap > (96 << 20)             # v5e/v6e (128 MiB) vs v7x (64 MiB)
    tb_cap = 512 if big_vmem else 256
    limit_cap = (100 << 20) if big_vmem else (52 << 20)

    TB = min(_round_up(B, 8), tb_cap)
    TN = OUT if (OUT <= 512 or OUT % 128 != 0) else 512   # lane-dense, 128-multiples
    grid_i = pl.cdiv(B, TB)
    grid_j = pl.cdiv(OUT, TN)
    # v7x has 2 TensorCores: try to give the parallel grid >= 2 steps.
    if not big_vmem and grid_i * grid_j == 1 and B >= 16:
        TB = _round_up(pl.cdiv(B, 2), 8)
        grid_i = pl.cdiv(B, TB)

    esz = jnp.dtype(matmul_dtype).itemsize
    osz = jnp.dtype(out_dtype).itemsize

    def run(single_buffer_invariants):
        def spec(shape, idx, *, single=False):
            if single:
                return pl.BlockSpec(shape, idx, pipeline_mode=pl.Buffered(1))
            return pl.BlockSpec(shape, idx)

        inv_bufs = 1 if single_buffer_invariants else 2
        inv_bytes = inv_bufs * (esz * IN * TN + 4 * TN + 4 * NC * TN)
        stream_bytes = 2 * (esz * TB * IN + 4 * TB + 2 * osz * TB * TN)
        vmem_bytes = int(min(max(2 * (inv_bytes + stream_bytes) + (2 << 20), 16 << 20),
                             limit_cap))

        return pl.pallas_call(
            _fc_block_kernel,
            out_shape=(jax.ShapeDtypeStruct((B, OUT), out_dtype),
                       jax.ShapeDtypeStruct((B, OUT), out_dtype)),
            grid_spec=pltpu.PrefetchScalarGridSpec(
                num_scalar_prefetch=0,
                grid=(grid_i, grid_j),
                in_specs=[
                    spec((TB, IN), lambda i, j: (i, 0)),                            # x (bf16)
                    spec((IN, TN), lambda i, j: (0, j), single=single_buffer_invariants),  # W^T
                    spec((1, TN), lambda i, j: (0, j), single=single_buffer_invariants),   # bias
                    spec((TB, 1), lambda i, j: (i, 0)),                             # class ids
                    spec((NC, TN), lambda i, j: (0, j), single=single_buffer_invariants),  # mod tbl
                ],
                out_specs=[
                    spec((TB, TN), lambda i, j: (i, j)),   # y   (lane-dense)
                    spec((TB, TN), lambda i, j: (i, j)),   # modulation
                ],
            ),
            compiler_params=pltpu.CompilerParams(
                dimension_semantics=("parallel", "parallel"),
                vmem_limit_bytes=vmem_bytes),
        )(x_mm, wt, b2, cls, mod_tbl)

    # Single-buffer the invariants only when there is no OUT tiling (truly
    # grid-invariant blocks).  Fall back to default double-buffering if this
    # jax build rejects pl.Buffered(1).
    if grid_j == 1:
        try:
            return run(True)
        except Exception:
            pass
    return run(False)


# ----------------------------- pure-JAX reference -----------------------------

def _expectation_dense(labels):
    NC = labels.shape[1]
    a_idx, b_idx = _expectation_indices(NC)
    cls = jnp.argmax(labels, axis=1)
    Ea = jax.nn.one_hot(jnp.asarray(a_idx)[cls], 2 * NC, dtype=jnp.float32)
    Eb = jax.nn.one_hot(jnp.asarray(b_idx)[cls], 2 * NC, dtype=jnp.float32)
    return (Ea + Eb) / 2.0


def _reference(x, w, b, labels, ni, matmul_dtype=jnp.bfloat16):
    # Same bf16 matmul operands / f32 accumulation as the kernel.
    z = jnp.dot(x.astype(matmul_dtype), w.T.astype(matmul_dtype),
                preferred_element_type=jnp.float32) + b
    y = jnp.tanh(z)
    E = _expectation_dense(labels)
    nl = E @ ni.reshape(E.shape[1], -1)
    li, tm = LAMBDA_INV, THETA_MAX
    p1 = tm - (tm - 1.0) * (4.0 * nl - li) ** 2 / li ** 2
    p2 = 4.0 * (nl - li) ** 2 / li ** 2
    p3 = -4.0 * (2.0 * li - nl - li) ** 2 / li ** 2
    p4 = (tm - 1.0) * (4.0 * (2.0 * li - nl) - li) ** 2 / li ** 2 - tm
    mod = jnp.where(nl <= 0.5 * li, p1,
          jnp.where(nl <= li, p2,
          jnp.where(nl <= 1.5 * li, p3, p4)))
    return y, mod


if __name__ == "__main__":
    B, IN, OUT, NUM_CLASSES = 8, 32, 128, 4

    key = jax.random.PRNGKey(0)
    k_x, k_w, k_b, k_ni, k_lab = jax.random.split(key, 5)

    x = jax.random.normal(k_x, (B, IN), dtype=jnp.float32)
    bound = 1.0 / np.sqrt(IN)
    w = jax.random.uniform(k_w, (OUT, IN), jnp.float32, -bound, bound)   # nn.Linear weight
    b = jax.random.uniform(k_b, (OUT,), jnp.float32, -bound, bound)      # nn.Linear bias
    # NI parameter, dim_hook = (2*num_classes, out_features), 'uniform' init
    ni = jax.random.uniform(k_ni, (2 * NUM_CLASSES, OUT), jnp.float32, 0.0, 1.0)
    # one-hot labels
    labels = jax.nn.one_hot(
        jax.random.randint(k_lab, (B,), 0, NUM_CLASSES), NUM_CLASSES, dtype=jnp.float32)

    y, mod = fc_block_forward(x, w, b, labels, ni)
    jax.block_until_ready((y, mod))

    y_ref, mod_ref = _reference(x, w, b, labels, ni)
    np.testing.assert_allclose(np.asarray(y), np.asarray(y_ref), rtol=2e-3, atol=2e-3)
    np.testing.assert_allclose(np.asarray(mod), np.asarray(mod_ref), rtol=1e-4, atol=1e-4)

    print("KERNEL_OK")
</pallas_src>

<mosaic_0001>
module attributes {stable_mosaic.version = 11 : i64} {
  func.func @_fc_block_kernel(%arg0: i32, %arg1: i32, %arg2: memref<8x32xbf16, #tpu.memory_space<vmem>>, %arg3: memref<32x128xbf16, #tpu.memory_space<vmem>>, %arg4: memref<1x128xf32, #tpu.memory_space<vmem>>, %arg5: memref<8x1xi32, #tpu.memory_space<vmem>>, %arg6: memref<4x128xf32, #tpu.memory_space<vmem>>, %arg7: memref<8x128xf32, #tpu.memory_space<vmem>>, %arg8: memref<8x128xf32, #tpu.memory_space<vmem>>) attributes {dimension_semantics = [#tpu.dimension_semantics<parallel>, #tpu.dimension_semantics<parallel>], iteration_bounds = array<i64: 1, 1>, scalar_prefetch = 0 : i64, scratch_operands = 0 : i64, tpu.core_type = #tpu.core_type<tc>, window_params = [{transform_indices = @transform_0, window_bounds = array<i64: 8, 32>}, {pipeline_mode = #tpu.pipeline_mode<synchronous>, transform_indices = @transform_1, window_bounds = array<i64: 32, 128>}, {pipeline_mode = #tpu.pipeline_mode<synchronous>, transform_indices = @transform_2, window_bounds = array<i64: 1, 128>}, {transform_indices = @transform_3, window_bounds = array<i64: 8, 1>}, {pipeline_mode = #tpu.pipeline_mode<synchronous>, transform_indices = @transform_4, window_bounds = array<i64: 4, 128>}, {transform_indices = @transform_5, window_bounds = array<i64: 8, 128>}, {transform_indices = @transform_6, window_bounds = array<i64: 8, 128>}]} {
    %c0 = arith.constant 0 : index
    %c0_0 = arith.constant 0 : index
    %0 = vector.load %arg2[%c0, %c0_0] : memref<8x32xbf16, #tpu.memory_space<vmem>>, vector<8x32xbf16>
    %c0_1 = arith.constant 0 : index
    %c0_2 = arith.constant 0 : index
    %1 = vector.load %arg3[%c0_1, %c0_2] : memref<32x128xbf16, #tpu.memory_space<vmem>>, vector<32x128xbf16>
    %cst = arith.constant dense<0.000000e+00> : vector<8x128xf32>
    %2 = tpu.matmul %0, %1, %cst {dimension_numbers = #tpu.dot_dimension_numbers<[1], [0], [0], [1], [0, 0, 1, 1], [], []>} : vector<8x32xbf16>, vector<32x128xbf16>, vector<8x128xf32> -> vector<8x128xf32>
    %c0_3 = arith.constant 0 : index
    %c0_4 = arith.constant 0 : index
    %3 = vector.load %arg4[%c0_3, %c0_4] : memref<1x128xf32, #tpu.memory_space<vmem>>, vector<1x128xf32>
    %4 = vector.broadcast %3 : vector<1x128xf32> to vector<8x128xf32>
    %5 = arith.addf %2, %4 : vector<8x128xf32>
    %6 = math.tanh %5 : vector<8x128xf32>
    %c0_5 = arith.constant 0 : index
    %c0_6 = arith.constant 0 : index
    %7 = vector.load %arg7[%c0_5, %c0_6] : memref<8x128xf32, #tpu.memory_space<vmem>>, vector<8x128xf32>
    tpu.vector_store %arg7[%c0_5, %c0_6], %6 {strides = array<i32>} : memref<8x128xf32, #tpu.memory_space<vmem>>, vector<8x128xf32>,
    %c0_7 = arith.constant 0 : index
    %c0_8 = arith.constant 0 : index
    %8 = vector.load %arg5[%c0_7, %c0_8] : memref<8x1xi32, #tpu.memory_space<vmem>>, vector<8x1xi32>
    %c0_9 = arith.constant 0 : index
    %c0_10 = arith.constant 0 : index
    %9 = vector.load %arg6[%c0_9, %c0_10] : memref<4x128xf32, #tpu.memory_space<vmem>>, vector<1x128xf32>
    %c1_i32 = arith.constant 1 : i32
    %10 = vector.broadcast %c1_i32 : i32 to vector<8x1xi32>
    %11 = arith.cmpi eq, %8, %10 : vector<8x1xi32>
    %c1 = arith.constant 1 : index
    %c0_11 = arith.constant 0 : index
    %12 = vector.load %arg6[%c1, %c0_11] : memref<4x128xf32, #tpu.memory_space<vmem>>, vector<1x128xf32>
    %13 = vector.shape_cast %11 : vector<8x1xi1> to vector<8x1xi1>
    %14 = vector.broadcast %13 : vector<8x1xi1> to vector<8x128xi1>
    %15 = vector.shape_cast %12 : vector<1x128xf32> to vector<1x128xf32>
    %16 = vector.broadcast %15 : vector<1x128xf32> to vector<8x128xf32>
    %17 = vector.shape_cast %9 : vector<1x128xf32> to vector<1x128xf32>
    %18 = vector.broadcast %17 : vector<1x128xf32> to vector<8x128xf32>
    %19 = arith.select %14, %16, %18 : vector<8x128xi1>, vector<8x128xf32>
    %c2_i32 = arith.constant 2 : i32
    %20 = vector.broadcast %c2_i32 : i32 to vector<8x1xi32>
    %21 = arith.cmpi eq, %8, %20 : vector<8x1xi32>
    %c2 = arith.constant 2 : index
    %c0_12 = arith.constant 0 : index
    %22 = vector.load %arg6[%c2, %c0_12] : memref<4x128xf32, #tpu.memory_space<vmem>>, vector<1x128xf32>
    %23 = vector.shape_cast %21 : vector<8x1xi1> to vector<8x1xi1>
    %24 = vector.broadcast %23 : vector<8x1xi1> to vector<8x128xi1>
    %25 = vector.shape_cast %22 : vector<1x128xf32> to vector<1x128xf32>
    %26 = vector.broadcast %25 : vector<1x128xf32> to vector<8x128xf32>
    %27 = arith.select %24, %26, %19 : vector<8x128xi1>, vector<8x128xf32>
    %c3_i32 = arith.constant 3 : i32
    %28 = vector.broadcast %c3_i32 : i32 to vector<8x1xi32>
    %29 = arith.cmpi eq, %8, %28 : vector<8x1xi32>
    %c3 = arith.constant 3 : index
    %c0_13 = arith.constant 0 : index
    %30 = vector.load %arg6[%c3, %c0_13] : memref<4x128xf32, #tpu.memory_space<vmem>>, vector<1x128xf32>
    %31 = vector.shape_cast %29 : vector<8x1xi1> to vector<8x1xi1>
    %32 = vector.broadcast %31 : vector<8x1xi1> to vector<8x128xi1>
    %33 = vector.shape_cast %30 : vector<1x128xf32> to vector<1x128xf32>
    %34 = vector.broadcast %33 : vector<1x128xf32> to vector<8x128xf32>
    %35 = arith.select %32, %34, %27 : vector<8x128xi1>, vector<8x128xf32>
    %c0_14 = arith.constant 0 : index
    %c0_15 = arith.constant 0 : index
    %36 = vector.load %arg8[%c0_14, %c0_15] : memref<8x128xf32, #tpu.memory_space<vmem>>, vector<8x128xf32>
    tpu.vector_store %arg8[%c0_14, %c0_15], %35 {strides = array<i32>} : memref<8x128xf32, #tpu.memory_space<vmem>>, vector<8x128xf32>,
    return
  }
  func.func @transform_0(%arg0: i32, %arg1: i32) -> (i32, i32) {
    %c0_i32 = arith.constant 0 : i32
    %c0_i32_0 = arith.constant 0 : i32
    return %arg0, %c0_i32 : i32, i32
  }
  func.func @transform_1(%arg0: i32, %arg1: i32) -> (i32, i32) {
    %c0_i32 = arith.constant 0 : i32
    %c0_i32_0 = arith.constant 0 : i32
    return %c0_i32, %arg1 : i32, i32
  }
  func.func @transform_2(%arg0: i32, %arg1: i32) -> (i32, i32) {
    %c0_i32 = arith.constant 0 : i32
    %c0_i32_0 = arith.constant 0 : i32
    return %c0_i32, %arg1 : i32, i32
  }
  func.func @transform_3(%arg0: i32, %arg1: i32) -> (i32, i32) {
    %c0_i32 = arith.constant 0 : i32
    %c0_i32_0 = arith.constant 0 : i32
    return %arg0, %c0_i32 : i32, i32
  }
  func.func @transform_4(%arg0: i32, %arg1: i32) -> (i32, i32) {
    %c0_i32 = arith.constant 0 : i32
    %c0_i32_0 = arith.constant 0 : i32
    return %c0_i32, %arg1 : i32, i32
  }
  func.func @transform_5(%arg0: i32, %arg1: i32) -> (i32, i32) {
    %c0_i32 = arith.constant 0 : i32
    return %arg0, %arg1 : i32, i32
  }
  func.func @transform_6(%arg0: i32, %arg1: i32) -> (i32, i32) {
    %c0_i32 = arith.constant 0 : i32
    return %arg0, %arg1 : i32, i32
  }
}

module attributes {stable_mosaic.version = 11 : i64} {
  func.func @_fc_block_kernel(%arg0: i32, %arg1: i32, %arg2: memref<8x32xbf16, #tpu.memory_space<vmem>>, %arg3: memref<32x128xbf16, #tpu.memory_space<vmem>>, %arg4: memref<1x128xf32, #tpu.memory_space<vmem>>, %arg5: memref<8x1xi32, #tpu.memory_space<vmem>>, %arg6: memref<4x128xf32, #tpu.memory_space<vmem>>, %arg7: memref<8x128xf32, #tpu.memory_space<vmem>>, %arg8: memref<8x128xf32, #tpu.memory_space<vmem>>) attributes {dimension_semantics = [#tpu.dimension_semantics<parallel>, #tpu.dimension_semantics<parallel>], iteration_bounds = array<i64: 1, 1>, scalar_prefetch = 0 : i64, scratch_operands = 0 : i64, tpu.core_type = #tpu.core_type<tc>, window_params = [{transform_indices = @transform_0, window_bounds = array<i64: 8, 32>}, {transform_indices = @transform_1, window_bounds = array<i64: 32, 128>}, {transform_indices = @transform_2, window_bounds = array<i64: 1, 128>}, {transform_indices = @transform_3, window_bounds = array<i64: 8, 1>}, {transform_indices = @transform_4, window_bounds = array<i64: 4, 128>}, {transform_indices = @transform_5, window_bounds = array<i64: 8, 128>}, {transform_indices = @transform_6, window_bounds = array<i64: 8, 128>}]} {
    %c0 = arith.constant 0 : index
    %c0_0 = arith.constant 0 : index
    %0 = vector.load %arg2[%c0, %c0_0] : memref<8x32xbf16, #tpu.memory_space<vmem>>, vector<8x32xbf16>
    %c0_1 = arith.constant 0 : index
    %c0_2 = arith.constant 0 : index
    %1 = vector.load %arg3[%c0_1, %c0_2] : memref<32x128xbf16, #tpu.memory_space<vmem>>, vector<32x128xbf16>
    %cst = arith.constant dense<0.000000e+00> : vector<8x128xf32>
    %2 = tpu.matmul %0, %1, %cst {dimension_numbers = #tpu.dot_dimension_numbers<[1], [0], [0], [1], [0, 0, 1, 1], [], []>} : vector<8x32xbf16>, vector<32x128xbf16>, vector<8x128xf32> -> vector<8x128xf32>
    %c0_3 = arith.constant 0 : index
    %c0_4 = arith.constant 0 : index
    %3 = vector.load %arg4[%c0_3, %c0_4] : memref<1x128xf32, #tpu.memory_space<vmem>>, vector<1x128xf32>
    %4 = vector.broadcast %3 : vector<1x128xf32> to vector<8x128xf32>
    %5 = arith.addf %2, %4 : vector<8x128xf32>
    %6 = math.tanh %5 : vector<8x128xf32>
    %c0_5 = arith.constant 0 : index
    %c0_6 = arith.constant 0 : index
    %7 = vector.load %arg7[%c0_5, %c0_6] : memref<8x128xf32, #tpu.memory_space<vmem>>, vector<8x128xf32>
    tpu.vector_store %arg7[%c0_5, %c0_6], %6 {strides = array<i32>} : memref<8x128xf32, #tpu.memory_space<vmem>>, vector<8x128xf32>,
    %c0_7 = arith.constant 0 : index
    %c0_8 = arith.constant 0 : index
    %8 = vector.load %arg5[%c0_7, %c0_8] : memref<8x1xi32, #tpu.memory_space<vmem>>, vector<8x1xi32>
    %c0_9 = arith.constant 0 : index
    %c0_10 = arith.constant 0 : index
    %9 = vector.load %arg6[%c0_9, %c0_10] : memref<4x128xf32, #tpu.memory_space<vmem>>, vector<1x128xf32>
    %c1_i32 = arith.constant 1 : i32
    %10 = vector.broadcast %c1_i32 : i32 to vector<8x1xi32>
    %11 = arith.cmpi eq, %8, %10 : vector<8x1xi32>
    %c1 = arith.constant 1 : index
    %c0_11 = arith.constant 0 : index
    %12 = vector.load %arg6[%c1, %c0_11] : memref<4x128xf32, #tpu.memory_space<vmem>>, vector<1x128xf32>
    %13 = vector.shape_cast %11 : vector<8x1xi1> to vector<8x1xi1>
    %14 = vector.broadcast %13 : vector<8x1xi1> to vector<8x128xi1>
    %15 = vector.shape_cast %12 : vector<1x128xf32> to vector<1x128xf32>
    %16 = vector.broadcast %15 : vector<1x128xf32> to vector<8x128xf32>
    %17 = vector.shape_cast %9 : vector<1x128xf32> to vector<1x128xf32>
    %18 = vector.broadcast %17 : vector<1x128xf32> to vector<8x128xf32>
    %19 = arith.select %14, %16, %18 : vector<8x128xi1>, vector<8x128xf32>
    %c2_i32 = arith.constant 2 : i32
    %20 = vector.broadcast %c2_i32 : i32 to vector<8x1xi32>
    %21 = arith.cmpi eq, %8, %20 : vector<8x1xi32>
    %c2 = arith.constant 2 : index
    %c0_12 = arith.constant 0 : index
    %22 = vector.load %arg6[%c2, %c0_12] : memref<4x128xf32, #tpu.memory_space<vmem>>, vector<1x128xf32>
    %23 = vector.shape_cast %21 : vector<8x1xi1> to vector<8x1xi1>
    %24 = vector.broadcast %23 : vector<8x1xi1> to vector<8x128xi1>
    %25 = vector.shape_cast %22 : vector<1x128xf32> to vector<1x128xf32>
    %26 = vector.broadcast %25 : vector<1x128xf32> to vector<8x128xf32>
    %27 = arith.select %24, %26, %19 : vector<8x128xi1>, vector<8x128xf32>
    %c3_i32 = arith.constant 3 : i32
    %28 = vector.broadcast %c3_i32 : i32 to vector<8x1xi32>
    %29 = arith.cmpi eq, %8, %28 : vector<8x1xi32>
    %c3 = arith.constant 3 : index
    %c0_13 = arith.constant 0 : index
    %30 = vector.load %arg6[%c3, %c0_13] : memref<4x128xf32, #tpu.memory_space<vmem>>, vector<1x128xf32>
    %31 = vector.shape_cast %29 : vector<8x1xi1> to vector<8x1xi1>
    %32 = vector.broadcast %31 : vector<8x1xi1> to vector<8x128xi1>
    %33 = vector.shape_cast %30 : vector<1x128xf32> to vector<1x128xf32>
    %34 = vector.broadcast %33 : vector<1x128xf32> to vector<8x128xf32>
    %35 = arith.select %32, %34, %27 : vector<8x128xi1>, vector<8x128xf32>
    %c0_14 = arith.constant 0 : index
    %c0_15 = arith.constant 0 : index
    %36 = vector.load %arg8[%c0_14, %c0_15] : memref<8x128xf32, #tpu.memory_space<vmem>>, vector<8x128xf32>
    tpu.vector_store %arg8[%c0_14, %c0_15], %35 {strides = array<i32>} : memref<8x128xf32, #tpu.memory_space<vmem>>, vector<8x128xf32>,
    return
  }
  func.func @transform_0(%arg0: i32, %arg1: i32) -> (i32, i32) {
    %c0_i32 = arith.constant 0 : i32
    %c0_i32_0 = arith.constant 0 : i32
    return %arg0, %c0_i32 : i32, i32
  }
  func.func @transform_1(%arg0: i32, %arg1: i32) -> (i32, i32) {
    %c0_i32 = arith.constant 0 : i32
    %c0_i32_0 = arith.constant 0 : i32
    return %c0_i32, %arg1 : i32, i32
  }
  func.func @transform_2(%arg0: i32, %arg1: i32) -> (i32, i32) {
    %c0_i32 = arith.constant 0 : i32
    %c0_i32_0 = arith.constant 0 : i32
    return %c0_i32, %arg1 : i32, i32
  }
  func.func @transform_3(%arg0: i32, %arg1: i32) -> (i32, i32) {
    %c0_i32 = arith.constant 0 : i32
    %c0_i32_0 = arith.constant 0 : i32
    return %arg0, %c0_i32 : i32, i32
  }
  func.func @transform_4(%arg0: i32, %arg1: i32) -> (i32, i32) {
    %c0_i32 = arith.constant 0 : i32
    %c0_i32_0 = arith.constant 0 : i32
    return %c0_i32, %arg1 : i32, i32
  }
  func.func @transform_5(%arg0: i32, %arg1: i32) -> (i32, i32) {
    %c0_i32 = arith.constant 0 : i32
    return %arg0, %arg1 : i32, i32
  }
  func.func @transform_6(%arg0: i32, %arg1: i32) -> (i32, i32) {
    %c0_i32 = arith.constant 0 : i32
    return %arg0, %arg1 : i32, i32
  }
}

</mosaic_0001>

<bundles_post_ra>
// kernel: tpu_custom_call.1
= control target key start
LH: loop header
LB: loop body
LE: loop exit
PB: predicated region body
PF: predicated region fallthrough
CT: control target
= control target key end

     0   :  { %12 = vsyncpa [#allocation3], 0  ;;  %s386_s0 = inlined_call_operand.vmem [shape: bf16[8,32], index: 0, kind: input, shape index: {}]   ;;  %s387_s1 = inlined_call_operand.hbm [shape: bf16[32,128], index: 1, kind: input, shape index: {}]   ;;  %s388_s2 = inlined_call_operand.vmem [shape: f32[1,128], index: 2, kind: input, shape index: {}]   ;;  %s389_s3 = inlined_call_operand.vmem [shape: s32[8,1], index: 3, kind: input, shape index: {}]   ;;  %s390_s4 = inlined_call_operand.vmem [shape: f32[4,128], index: 4, kind: input, shape index: {}]   ;;  %s391_s5 = inlined_call_operand.hbm [shape: f32[8,128], index: 5, kind: output, shape index: {0}]   ;;  %s392_s6 = inlined_call_operand.hbm [shape: f32[8,128], index: 6, kind: output, shape index: {1}]  }
   0x1   :  { %13 = vsyncpa [#allocation4], 0 }
   0x2   :  { %14 = vsyncpa [#allocation7], 0  ;;  %s286_s21 = smov [#allocation2]   ;;  %s214_s25 = scalar_lea.hbm %s387_s1, 256 }
   0x3   :  { %s22_s22 = sshll.u32 %s286_s21, 4  ;;  %p215_p0 = scmp.ne.s32.totalorder %s387_s1, %s214_s25  ;;  %s23_s22 = int_to_ptr.vmem [resolvable:$true] %s22_s22 }
   0x4   :  { %p218_p1 = scmp.lt.u32.totalorder %s214_s25, %s387_s1 }
   0x6   :  { %p220_p2 = pnand %p218_p1, %p215_p0 }
   0x8   :  { %223 = shalt.err (!%p220_p2)
}
   0x9   :  { %s224_s30 = scalar_lea.vmem %s23_s22, 256  ;;  %p229_p4 = scmp.lt.s32.totalorder %s23_s22, %s23_s22 }
   0xa   :  { %p225_p3 = scmp.ne.s32.totalorder %s23_s22, %s224_s30  ;;  %p230_p5 = scmp.lt.s32.totalorder %s224_s30, %s224_s30 }
   0xc   :  { %p231_p6 = por %p230_p5, %p229_p4 }
   0xe   :  { %p232_p7 = pnand %p231_p6, %p225_p3 }
  0x10   :  { %235 = shalt.err (!%p232_p7)
}
  0x11   :  { %s287_s7 = smov 64   ;;  %s288_s8 = smov 4  }
  0x12   :  { %28 = dma.hbm_to_vmem [thread:$0]  %s387_s1, 256, %s23_s22, [#allocation3], %s287_s7, %s287_s7, %s288_s8  }
  0x13   :  { %280 = dma.done.wait [#allocation3], 256  }
  0x14   :  { %281 = vsyncadd [#allocation3], 4294967040  ;;  %v289_v0 = vmov 0.0   ;;  %vm290_vm0 = vmmov 0   ;;  %v291_v1 = vmov 0   ;;  %v210_v2 = vld [vmem:[#allocation2] sm:$0xff]  }
  0x15   :  { %192 = vmatprep.subr.bf16.mxu0 %v289_v0  ;;  %196 = vmatprep.mubr.msk.bf16.mxu0 %vm290_vm0, %v289_v0  ;;  %v211_v3 = vld [vmem:[#allocation2 + $0x8] sm:$0xff]   ;;  %v109_v4 = vld [vmem:[%s389_s3] sm:$0xff]  ;;  %vm63_vm4 = vcmask 261120  }
  0x16   :  { %208 = vset.pattern.permute.xlu0 %v291_v1  ;;  %209 = vset.pattern.permute.xlu1 %v291_v1  ;;  %vm111_vm1 = vcmp.eq.s32.totalorder %v109_v4, 1  ;;  %vm127_vm2 = vcmp.eq.s32.totalorder %v109_v4, 2  ;;  %vm139_vm3 = vcmp.eq.s32.totalorder %v109_v4, 3  ;;  %v39_v7 = vld [vmem:[%s386_s0] sm:$0xf]  ;;  %s292_s0 = smov [#allocation6]  }
  0x17   :  { %193 = vmatpush3.bf16.msra.mxu0 %v210_v2  ;;  %v113_v5 = vsel %vm111_vm1, 1, %v291_v1  ;;  %v141_v6 = vsel %vm139_vm3, 1, %v291_v1  ;;  %v129_v8 = vsel %vm127_vm2, 1, %v291_v1  ;;  %v186_v9 = vld [vmem:[%s390_s4] ss:$0 sm:$0xff]  ;;  %s168_s19 = sshll.u32 %s292_s0, 4  ;;  %s169_s19 = int_to_ptr.vmem [resolvable:$true] %s168_s19 }
  0x18   :  { %194 = vmatprep.subr.bf16.mxu0 %v289_v0  ;;  %115 = vperm.xlu0 %208, %v113_v5   ;;  %v185_v10 = vld [vmem:[%s390_s4 + $0x1] ss:$0 sm:$0xff]  ;;  %v187_v14 = vld [vmem:[%s390_s4 + $0x2] ss:$0 sm:$0xff]  ;;  %v188_v16 = vld [vmem:[%s390_s4 + $0x3] ss:$0 sm:$0xff]  ;;  %p241_p9 = scmp.lt.s32.totalorder %s169_s19, %s169_s19 }
  0x19   :  { %143 = vperm.xlu1 %209, %v141_v6   ;;  %s236_s22 = scalar_lea.vmem %s169_s19, 128 }
  0x1a   :  { %p237_p8 = scmp.ne.s32.totalorder %s169_s19, %s236_s22  ;;  %p242_p10 = scmp.lt.s32.totalorder %s236_s22, %s236_s22 }
  0x1b   :  { %195 = vmatpush3.bf16.msra.mxu0 %v211_v3 }
  0x1c   :  { %131 = vperm.xlu0 %208, %v129_v8   ;;  %p243_p11 = por %p242_p10, %p241_p9 }
  0x1e   :  { %197 = vmatmul.mubr.msk.bf16.vlgmr.msra.gmra.mrb[0].mxu0 %vm63_vm4, %v39_v7  ;;  %p244_p12 = pnand %p243_p11, %p237_p8 }
  0x97   :  { %v116_v11 = vpop.permute.xlu0 %115 }
  0x98   :  { %vm117_vm5 = vcmp.eq.s32.totalorder %v116_v11, 1  ;;  %v144_v12 = vpop.permute.xlu1 %143 }
  0x99   :  { %v126_v13 = vsel %vm117_vm5, %v185_v10, %v186_v9  ;;  %vm145_vm6 = vcmp.eq.s32.totalorder %v144_v12, 1 }
  0x9b   :  { %v132_v15 = vpop.permute.xlu0 %131 }
  0x9c   :  { %vm133_vm7 = vcmp.eq.s32.totalorder %v132_v15, 1 }
  0x9d   :  { %v138_v17 = vsel %vm133_vm7, %v187_v14, %v126_v13 }
  0x9e   :  { %v150_v18 = vsel %vm145_vm6, %v188_v16, %v138_v17 }
  0x9f   :  { %151 = vst [vmem:[#allocation6] sm:$0xff] %v150_v18 }
  0xa0   :  { %247 = shalt.err (!%p244_p12)
}
  0xa1   :  { %s248_s25 = scalar_lea.hbm %s392_s6, 128 }
  0xa2   :  { %p249_p13 = scmp.ne.s32.totalorder %s392_s6, %s248_s25  ;;  %p252_p0 = scmp.lt.u32.totalorder %s248_s25, %s392_s6 }
  0xa4   :  { %p254_p1 = pnand %p252_p0, %p249_p13 }
  0xa6   :  { %257 = shalt.err (!%p254_p1)
}
  0xa7   :  { %171 = dma.vmem_to_hbm [thread:$0]  %s169_s19, 128, %s392_s6, [#allocation7]   ;;  %v181_v19 = vld [vmem:[%s388_s2] ss:$0 sm:$0xff] }
  0xa8   :  { %s293_s9 = smov [#allocation5]  }
  0xa9   :  { %s158_s10 = sshll.u32 %s293_s9, 4  ;;  %s159_s10 = int_to_ptr.vmem [resolvable:$true] %s158_s10 }
  0xaa   :  { %s258_s11 = scalar_lea.vmem %s159_s10, 128  ;;  %p263_p3 = scmp.lt.s32.totalorder %s159_s10, %s159_s10 }
  0xab   :  { %p259_p2 = scmp.ne.s32.totalorder %s159_s10, %s258_s11  ;;  %p264_p4 = scmp.lt.s32.totalorder %s258_s11, %s258_s11 }
  0xad   :  { %p265_p5 = por %p264_p4, %p263_p3 }
  0xaf   :  { %p266_p6 = pnand %p265_p5, %p259_p2 }
  0xf1   :  { %v101_v20 = vpop.f32.mrb[0].mxu0 }
  0xf2   :  { %v102_v21 = vadd.f32 %v181_v19, %v101_v20  ;;  %v198_v22 = vpop.f32.mrb[1].mxu0 }
  0xf3   :  { %v104_v23 = vpop.f32.mrb[2].mxu0 }
  0xf4   :  { %212 = vtanh.f32 %v102_v21  ;;  %v199_v24 = vpop.f32.mrb[3].mxu0 }
  0xfe   :  { %v213_v25 = vpop.eup %212 }
  0xff   :  { %108 = vst [vmem:[#allocation5] sm:$0xff] %v213_v25 }
 0x100   :  { %269 = shalt.err (!%p266_p6)
}
 0x101   :  { %s270_s12 = scalar_lea.hbm %s391_s5, 128 }
 0x102   :  { %p271_p7 = scmp.ne.s32.totalorder %s391_s5, %s270_s12  ;;  %p274_p8 = scmp.lt.u32.totalorder %s270_s12, %s391_s5 }
 0x104   :  { %p276_p9 = pnand %p274_p8, %p271_p7 }
 0x106   :  { %279 = shalt.err (!%p276_p9)
}
 0x107   :  { %161 = dma.vmem_to_hbm [thread:$0]  %s159_s10, 128, %s391_s5, [#allocation4]  }
 0x108   :  { %282 = dma.done.wait [#allocation4], 128  }
 0x109   :  { %283 = vsyncadd [#allocation4], 4294967168 }
 0x10a   :  { %284 = dma.done.wait [#allocation7], 128  }
 0x10b   :  { %285 = vsyncadd [#allocation7], 4294967168 }
 0x10c   :  { %178 = vsyncpa [#allocation3], 1 }
 0x10d   :  { %179 = vsyncpa [#allocation4], 1 }
 0x10e   :  { %180 = vsyncpa [#allocation7], 1 }

// kernel: tpu_custom_call.1
= control target key start
LH: loop header
LB: loop body
LE: loop exit
PB: predicated region body
PF: predicated region fallthrough
CT: control target
= control target key end

     0   :  { %12 = vsyncpa [#allocation3], 0  ;;  %s386_s0 = inlined_call_operand.vmem [shape: bf16[8,32], index: 0, kind: input, shape index: {}]   ;;  %s387_s1 = inlined_call_operand.hbm [shape: bf16[32,128], index: 1, kind: input, shape index: {}]   ;;  %s388_s2 = inlined_call_operand.vmem [shape: f32[1,128], index: 2, kind: input, shape index: {}]   ;;  %s389_s3 = inlined_call_operand.vmem [shape: s32[8,1], index: 3, kind: input, shape index: {}]   ;;  %s390_s4 = inlined_call_operand.vmem [shape: f32[4,128], index: 4, kind: input, shape index: {}]   ;;  %s391_s5 = inlined_call_operand.hbm [shape: f32[8,128], index: 5, kind: output, shape index: {0}]   ;;  %s392_s6 = inlined_call_operand.hbm [shape: f32[8,128], index: 6, kind: output, shape index: {1}]  }
   0x1   :  { %13 = vsyncpa [#allocation4], 0 }
   0x2   :  { %14 = vsyncpa [#allocation7], 0  ;;  %s286_s21 = smov [#allocation2]   ;;  %s214_s25 = scalar_lea.hbm %s387_s1, 256 }
   0x3   :  { %s22_s22 = sshll.u32 %s286_s21, 4  ;;  %p215_p0 = scmp.ne.s32.totalorder %s387_s1, %s214_s25  ;;  %s23_s22 = int_to_ptr.vmem [resolvable:$true] %s22_s22 }
   0x4   :  { %p218_p1 = scmp.lt.u32.totalorder %s214_s25, %s387_s1 }
   0x6   :  { %p220_p2 = pnand %p218_p1, %p215_p0 }
   0x8   :  { %223 = shalt.err (!%p220_p2)
}
   0x9   :  { %s224_s30 = scalar_lea.vmem %s23_s22, 256  ;;  %p229_p4 = scmp.lt.s32.totalorder %s23_s22, %s23_s22 }
   0xa   :  { %p225_p3 = scmp.ne.s32.totalorder %s23_s22, %s224_s30  ;;  %p230_p5 = scmp.lt.s32.totalorder %s224_s30, %s224_s30 }
   0xc   :  { %p231_p6 = por %p230_p5, %p229_p4 }
   0xe   :  { %p232_p7 = pnand %p231_p6, %p225_p3 }
  0x10   :  { %235 = shalt.err (!%p232_p7)
}
  0x11   :  { %s287_s7 = smov 64   ;;  %s288_s8 = smov 4  }
  0x12   :  { %28 = dma.hbm_to_vmem [thread:$0]  %s387_s1, 256, %s23_s22, [#allocation3], %s287_s7, %s287_s7, %s288_s8  }
  0x13   :  { %280 = dma.done.wait [#allocation3], 256  }
  0x14   :  { %281 = vsyncadd [#allocation3], 4294967040  ;;  %v289_v0 = vmov 0.0   ;;  %vm290_vm0 = vmmov 0   ;;  %v291_v1 = vmov 0   ;;  %v210_v2 = vld [vmem:[#allocation2] sm:$0xff]  }
  0x15   :  { %192 = vmatprep.subr.bf16.mxu0 %v289_v0  ;;  %196 = vmatprep.mubr.msk.bf16.mxu0 %vm290_vm0, %v289_v0  ;;  %v211_v3 = vld [vmem:[#allocation2 + $0x8] sm:$0xff]   ;;  %v109_v4 = vld [vmem:[%s389_s3] sm:$0xff]  ;;  %vm63_vm4 = vcmask 261120  }
  0x16   :  { %208 = vset.pattern.permute.xlu0 %v291_v1  ;;  %209 = vset.pattern.permute.xlu1 %v291_v1  ;;  %vm111_vm1 = vcmp.eq.s32.totalorder %v109_v4, 1  ;;  %vm127_vm2 = vcmp.eq.s32.totalorder %v109_v4, 2  ;;  %vm139_vm3 = vcmp.eq.s32.totalorder %v109_v4, 3  ;;  %v39_v7 = vld [vmem:[%s386_s0] sm:$0xf]  ;;  %s292_s0 = smov [#allocation6]  }
  0x17   :  { %193 = vmatpush3.bf16.msra.mxu0 %v210_v2  ;;  %v113_v5 = vsel %vm111_vm1, 1, %v291_v1  ;;  %v141_v6 = vsel %vm139_vm3, 1, %v291_v1  ;;  %v129_v8 = vsel %vm127_vm2, 1, %v291_v1  ;;  %v186_v9 = vld [vmem:[%s390_s4] ss:$0 sm:$0xff]  ;;  %s168_s19 = sshll.u32 %s292_s0, 4  ;;  %s169_s19 = int_to_ptr.vmem [resolvable:$true] %s168_s19 }
  0x18   :  { %194 = vmatprep.subr.bf16.mxu0 %v289_v0  ;;  %115 = vperm.xlu0 %208, %v113_v5   ;;  %v185_v10 = vld [vmem:[%s390_s4 + $0x1] ss:$0 sm:$0xff]  ;;  %v187_v14 = vld [vmem:[%s390_s4 + $0x2] ss:$0 sm:$0xff]  ;;  %v188_v16 = vld [vmem:[%s390_s4 + $0x3] ss:$0 sm:$0xff]  ;;  %p241_p9 = scmp.lt.s32.totalorder %s169_s19, %s169_s19 }
  0x19   :  { %143 = vperm.xlu1 %209, %v141_v6   ;;  %s236_s22 = scalar_lea.vmem %s169_s19, 128 }
  0x1a   :  { %p237_p8 = scmp.ne.s32.totalorder %s169_s19, %s236_s22  ;;  %p242_p10 = scmp.lt.s32.totalorder %s236_s22, %s236_s22 }
  0x1b   :  { %195 = vmatpush3.bf16.msra.mxu0 %v211_v3 }
  0x1c   :  { %131 = vperm.xlu0 %208, %v129_v8   ;;  %p243_p11 = por %p242_p10, %p241_p9 }
  0x1e   :  { %197 = vmatmul.mubr.msk.bf16.vlgmr.msra.gmra.mrb[0].mxu0 %vm63_vm4, %v39_v7  ;;  %p244_p12 = pnand %p243_p11, %p237_p8 }
  0x97   :  { %v116_v11 = vpop.permute.xlu0 %115 }
  0x98   :  { %vm117_vm5 = vcmp.eq.s32.totalorder %v116_v11, 1  ;;  %v144_v12 = vpop.permute.xlu1 %143 }
  0x99   :  { %v126_v13 = vsel %vm117_vm5, %v185_v10, %v186_v9  ;;  %vm145_vm6 = vcmp.eq.s32.totalorder %v144_v12, 1 }
  0x9b   :  { %v132_v15 = vpop.permute.xlu0 %131 }
  0x9c   :  { %vm133_vm7 = vcmp.eq.s32.totalorder %v132_v15, 1 }
  0x9d   :  { %v138_v17 = vsel %vm133_vm7, %v187_v14, %v126_v13 }
  0x9e   :  { %v150_v18 = vsel %vm145_vm6, %v188_v16, %v138_v17 }
  0x9f   :  { %151 = vst [vmem:[#allocation6] sm:$0xff] %v150_v18 }
  0xa0   :  { %247 = shalt.err (!%p244_p12)
}
  0xa1   :  { %s248_s25 = scalar_lea.hbm %s392_s6, 128 }
  0xa2   :  { %p249_p13 = scmp.ne.s32.totalorder %s392_s6, %s248_s25  ;;  %p252_p0 = scmp.lt.u32.totalorder %s248_s25, %s392_s6 }
  0xa4   :  { %p254_p1 = pnand %p252_p0, %p249_p13 }
  0xa6   :  { %257 = shalt.err (!%p254_p1)
}
  0xa7   :  { %171 = dma.vmem_to_hbm [thread:$0]  %s169_s19, 128, %s392_s6, [#allocation7]   ;;  %v181_v19 = vld [vmem:[%s388_s2] ss:$0 sm:$0xff] }
  0xa8   :  { %s293_s9 = smov [#allocation5]  }
  0xa9   :  { %s158_s10 = sshll.u32 %s293_s9, 4  ;;  %s159_s10 = int_to_ptr.vmem [resolvable:$true] %s158_s10 }
  0xaa   :  { %s258_s11 = scalar_lea.vmem %s159_s10, 128  ;;  %p263_p3 = scmp.lt.s32.totalorder %s159_s10, %s159_s10 }
  0xab   :  { %p259_p2 = scmp.ne.s32.totalorder %s159_s10, %s258_s11  ;;  %p264_p4 = scmp.lt.s32.totalorder %s258_s11, %s258_s11 }
  0xad   :  { %p265_p5 = por %p264_p4, %p263_p3 }
  0xaf   :  { %p266_p6 = pnand %p265_p5, %p259_p2 }
  0xf1   :  { %v101_v20 = vpop.f32.mrb[0].mxu0 }
  0xf2   :  { %v102_v21 = vadd.f32 %v181_v19, %v101_v20  ;;  %v198_v22 = vpop.f32.mrb[1].mxu0 }
  0xf3   :  { %v104_v23 = vpop.f32.mrb[2].mxu0 }
  0xf4   :  { %212 = vtanh.f32 %v102_v21  ;;  %v199_v24 = vpop.f32.mrb[3].mxu0 }
  0xfe   :  { %v213_v25 = vpop.eup %212 }
  0xff   :  { %108 = vst [vmem:[#allocation5] sm:$0xff] %v213_v25 }
 0x100   :  { %269 = shalt.err (!%p266_p6)
}
 0x101   :  { %s270_s12 = scalar_lea.hbm %s391_s5, 128 }
 0x102   :  { %p271_p7 = scmp.ne.s32.totalorder %s391_s5, %s270_s12  ;;  %p274_p8 = scmp.lt.u32.totalorder %s270_s12, %s391_s5 }
 0x104   :  { %p276_p9 = pnand %p274_p8, %p271_p7 }
 0x106   :  { %279 = shalt.err (!%p276_p9)
}
 0x107   :  { %161 = dma.vmem_to_hbm [thread:$0]  %s159_s10, 128, %s391_s5, [#allocation4]  }
 0x108   :  { %282 = dma.done.wait [#allocation4], 128  }
 0x109   :  { %283 = vsyncadd [#allocation4], 4294967168 }
 0x10a   :  { %284 = dma.done.wait [#allocation7], 128  }
 0x10b   :  { %285 = vsyncadd [#allocation7], 4294967168 }
 0x10c   :  { %178 = vsyncpa [#allocation3], 1 }
 0x10d   :  { %179 = vsyncpa [#allocation4], 1 }
 0x10e   :  { %180 = vsyncpa [#allocation7], 1 }

</bundles_post_ra>
